<compile_context>
chip_gen: v7x
topology: tpu7x:2x2x1
jax: 0.10.0
libtpu: 0.0.40
codegen_flags: <defaults>
</compile_context>

<pallas_src>
import math
import numpy as np
import jax
import jax.numpy as jnp
from jax.experimental import pallas as pl
from jax.experimental.pallas import tpu as pltpu

TWO_PI = 2.0 * math.pi

_LANE = 128      # lane (last-dim) tile
_SUBLANE = 8     # sublane (second-to-last dim) tile

# Additive pad-lane biases for the masked min/max.  Finite, and only one bias
# is ever added to a value, so no overflow to inf.
_BIG = np.float32(1e38)


def _round_up(n, m):
    return ((n + m - 1) // m) * m


# ----------------------------------------------------------------------------
# Fused Pallas kernel: all reservoir layers + readout in one invocation
# ----------------------------------------------------------------------------
def make_fused_kernel(layer_shapes):
    """layer_shapes: list of (r_valid, r_pad) per reservoir layer."""
    n_layers = len(layer_shapes)

    def kernel(x_ref, driver_ref, *rest):
        # rest = [adj_0, vec_0, adj_1, vec_1, ..., mask, out]
        layer_refs = rest[:2 * n_layers]
        mask_ref = rest[2 * n_layers]
        out_ref = rest[2 * n_layers + 1]

        x = x_ref[...]                                       # [b_pad, f_pad]

        for li, (r_valid, r_pad) in enumerate(layer_shapes):
            adj_ref = layer_refs[2 * li + 0]                 # [r_pad, r_pad] bf16
            vec_ref = layer_refs[2 * li + 1]                 # [8, r_pad] f32

            state = vec_ref[0:1, :]
            alpha = vec_ref[1:2, :]
            k_over_2pi = vec_ref[2:3, :]                     # k / (2*pi)
            omega = vec_ref[3:4, :]
            colsum = vec_ref[4:5, :]                         # ones @ adjacency

            if li == 0:
                # Sparse driver: general matmul on the MXU.
                driven = state + jnp.dot(x, driver_ref[...],
                                         preferred_element_type=jnp.float32)
            else:
                # transitions[li] == full(1/r_valid):  x @ T == rowsum(x) / r.
                driven = state + (1.0 / float(r_valid)) * jnp.sum(
                    x, axis=-1, keepdims=True)

            # Couple through the reservoir graph first (MXU) so the scalar
            # min/max reduce (XLU) overlaps it.  bf16 0/1 upcasts exactly.
            adj = adj_ref[...].astype(jnp.float32)
            raw = jnp.dot(driven, adj, preferred_element_type=jnp.float32)

            # Global min/max over the valid [B, r_valid] region.  Padded batch
            # rows are duplicates of row 0 (harmless); padded lanes are pushed
            # out of range with precomputed additive biases.
            if r_valid < r_pad:
                neg_bias = vec_ref[5:6, :]                   # 0 valid / -1e38 pad
                pos_bias = vec_ref[6:7, :]                   # 0 valid / +1e38 pad
                dsmax = jnp.max(driven + neg_bias)
                dsmin = jnp.min(driven + pos_bias)
            else:
                dsmax = jnp.max(driven)
                dsmin = jnp.min(driven)

            # ((driven - dsmin) * inv) @ adj == inv*raw - (inv*dsmin)*colsum
            # (no epsilon guard: dsmax == dsmin diverges exactly like the
            #  PyTorch reference).
            inv = 1.0 / (dsmax - dsmin)
            thetas = inv * raw - (inv * dsmin) * colsum

            # Sine-circle-map update (VPU + EUP).  alpha/k/omega are 0 in
            # padded lanes, so the activation stays exactly 0 there.
            x = alpha * thetas + omega + k_over_2pi * jnp.sin(TWO_PI * thetas)

        # Final readout (MXU matmul), lane-dense padded output slab.
        out_ref[...] = jnp.dot(x, mask_ref[...],
                               preferred_element_type=jnp.float32)

    return kernel


# ----------------------------------------------------------------------------
# Per-generation VMEM budgeting
# ----------------------------------------------------------------------------
def _pick_vmem_limit(packed, b_pad):
    need = b_pad * packed["f_pad"] * 4                      # x
    need += packed["driver"].size * 4
    max_rpad = _SUBLANE
    for adj, vec in packed["layers"]:
        need += adj.size * 2 + vec.size * 4                 # bf16 adj + f32 vec
        max_rpad = max(max_rpad, adj.shape[0])
    need += packed["mask"].size * 4
    need += b_pad * packed["o_pad"] * 4                     # out
    need += max_rpad * max_rpad * 4                         # one f32 upcast adj copy
    need += 8 * b_pad * max_rpad * 4                        # activation / temp slabs
    need += 2 << 20                                         # compiler scratch slack

    try:
        cap = int(getattr(pltpu.get_tpu_info(), "vmem_capacity_bytes", 64 << 20))
    except Exception:
        cap = 64 << 20                                      # conservative (v7x)
    headroom = 12 << 20
    return int(min(max(need, 16 << 20), cap - headroom))


# ----------------------------------------------------------------------------
# Wrapper: pad the input, run the single fused pallas_call, slice the result
# ----------------------------------------------------------------------------
def multilayer_scm_forward(x, packed):
    """Runs the fused kernel; returns [B, output_size] float32."""
    B, F = x.shape
    b_pad = _round_up(max(B, 1), _SUBLANE)
    f_pad = packed["f_pad"]

    x_f32 = x.astype(jnp.float32)
    x_pad = jnp.zeros((b_pad, f_pad), jnp.float32)
    x_pad = x_pad.at[:B, :F].set(x_f32)
    if b_pad > B:
        # Padded batch rows replicate row 0: they ride through every layer as
        # exact duplicates of a valid row, so the global min/max needs no row
        # masking.  They are sliced off at the end.
        x_pad = x_pad.at[B:, :F].set(
            jnp.broadcast_to(x_f32[0:1, :], (b_pad - B, F)))

    inputs = [x_pad, packed["driver"]]
    for adj, vec in packed["layers"]:
        inputs.extend([adj, vec])
    inputs.append(packed["mask"])

    kernel = make_fused_kernel(packed["layer_shapes"])
    vmem = pl.BlockSpec(memory_space=pltpu.MemorySpace.VMEM)

    out_pad = pl.pallas_call(
        kernel,
        out_shape=jax.ShapeDtypeStruct((b_pad, packed["o_pad"]), jnp.float32),
        in_specs=[vmem] * len(inputs),
        out_specs=vmem,
        compiler_params=pltpu.CompilerParams(
            vmem_limit_bytes=_pick_vmem_limit(packed, b_pad)),
        # TODO(synk): once R_pad exceeds ~2k (v7x, 64 MiB VMEM) / ~4k (v5e/v6e),
        # move the adjacencies to memory_space=pl.ANY and double-buffer the
        # next layer's weights with pltpu.make_async_copy so VMEM residency
        # caps at ~2 layers instead of all of them.
        # TODO(synk): the global min/max couples all batch rows, so this runs
        # on one TensorCore; a v7x megacore split needs a two-phase reduction.
    )(*inputs)

    return out_pad[:B, :packed["output_size"]]


# ----------------------------------------------------------------------------
# Deterministic parameter construction (mirrors MultilayerSCMNet.__init__)
# ----------------------------------------------------------------------------
def watts_strogatz_adjacency(n, k=4, p=0.5, seed=0):
    """Deterministic Watts-Strogatz graph adjacency (0/1, symmetric)."""
    rng = np.random.RandomState(seed)
    adj = np.zeros((n, n), dtype=np.float32)
    half = k // 2
    # ring lattice
    for j in range(1, half + 1):
        for i in range(n):
            adj[i, (i + j) % n] = 1.0
            adj[(i + j) % n, i] = 1.0
    # rewiring
    for j in range(1, half + 1):
        for i in range(n):
            if rng.rand() < p:
                old = (i + j) % n
                candidates = np.where(adj[i] == 0)[0]
                candidates = candidates[candidates != i]
                if candidates.size > 0:
                    new = int(candidates[rng.randint(candidates.size)])
                    adj[i, old] = 0.0
                    adj[old, i] = 0.0
                    adj[i, new] = 1.0
                    adj[new, i] = 1.0
    return adj


def build_params(input_size, output_size, reservoir_sizes,
                 input_spread=1, output_spread=1, seed=0):
    """Logical (unpadded) parameters, same math as the PyTorch module."""
    key = jax.random.PRNGKey(seed)

    # driver (transitions[0]): deterministic "random.sample" substitute
    driver = np.zeros((input_size, reservoir_sizes[0]), dtype=np.float32)
    for i in range(input_size):
        for s in range(input_spread):
            driver[i, (i * input_spread + s) % reservoir_sizes[0]] = 1.0 / input_spread

    transitions = [jnp.asarray(driver)]
    for i, r in enumerate(reservoir_sizes[1:]):
        transitions.append(
            jnp.full((reservoir_sizes[i], r), 1.0 / r, dtype=jnp.float32))

    # output mask
    mask = np.zeros((reservoir_sizes[-1], output_size), dtype=np.float32)
    for o in range(output_size):
        for s in range(output_spread):
            mask[(o * output_spread + s) % reservoir_sizes[-1], o] = 1.0 / output_spread
    mask = jnp.asarray(mask)

    layers = []
    for li, r in enumerate(reservoir_sizes):
        key, k1, k2, k3, k4 = jax.random.split(key, 5)
        alpha = jax.random.uniform(k1, (r,), dtype=jnp.float32)
        ks = jax.random.uniform(k2, (r,), dtype=jnp.float32)
        omega = jax.random.uniform(k3, (r,), dtype=jnp.float32)
        state = jax.random.uniform(k4, (r,), dtype=jnp.float32)
        adjacency = jnp.asarray(watts_strogatz_adjacency(r, k=4, p=0.5, seed=li))
        layers.append((transitions[li], state, adjacency, alpha, ks, omega))

    return {"layers": layers, "mask": mask,
            "input_size": input_size, "output_size": output_size,
            "reservoir_sizes": list(reservoir_sizes)}


def pack_params(params):
    """Pad to (8,128)-aligned tiles, pack per-reservoir vectors, bf16 weights."""
    input_size = params["input_size"]
    output_size = params["output_size"]
    reservoir_sizes = params["reservoir_sizes"]

    f_pad = _round_up(input_size, _LANE)
    r_pads = [_round_up(r, _LANE) for r in reservoir_sizes]
    o_pad = _round_up(output_size, _LANE)

    # Driver (layer-0 transition) stays f32 (tiny; 1/input_spread may not be
    # bf16-exact).  Padded rows/cols are zero.
    driver_logical = np.asarray(params["layers"][0][0])
    drv = np.zeros((f_pad, r_pads[0]), np.float32)
    drv[:input_size, :reservoir_sizes[0]] = driver_logical

    packed_layers = []
    for li, (_, state, adjacency, alpha, k, omega) in enumerate(params["layers"]):
        r = reservoir_sizes[li]
        r_pad = r_pads[li]

        a = np.zeros((r_pad, r_pad), np.float32)
        a[:r, :r] = np.asarray(adjacency)

        # Pack {state, alpha, k/(2*pi), omega, colsum, -bias, +bias} into one
        # sublane-aligned [8, r_pad] array.
        vec = np.zeros((_SUBLANE, r_pad), np.float32)
        vec[0, :r] = np.asarray(state)
        vec[1, :r] = np.asarray(alpha)
        vec[2, :r] = np.asarray(k) / TWO_PI
        vec[3, :r] = np.asarray(omega)
        vec[4, :] = a.sum(axis=0)          # ones @ adjacency (pad lanes -> 0)
        vec[5, r:] = -_BIG                 # max-mask bias for padded lanes
        vec[6, r:] = _BIG                  # min-mask bias for padded lanes

        # Adjacency is exactly 0/1 -> bf16 storage is lossless; halves DMA.
        packed_layers.append((jnp.asarray(a, dtype=jnp.bfloat16),
                              jnp.asarray(vec)))

    m = np.zeros((r_pads[-1], o_pad), np.float32)
    m[:reservoir_sizes[-1], :output_size] = np.asarray(params["mask"])

    return {
        "driver": jnp.asarray(drv),
        "layers": packed_layers,
        "mask": jnp.asarray(m),
        "f_pad": f_pad,
        "o_pad": o_pad,
        "layer_shapes": [(reservoir_sizes[i], r_pads[i])
                         for i in range(len(reservoir_sizes))],
        "output_size": output_size,
    }


# ----------------------------------------------------------------------------
# Pure-JAX reference (same math as the PyTorch module, no Pallas)
# ----------------------------------------------------------------------------
def reference_forward(x, params):
    x = x.astype(jnp.float32)
    for (transition, state, adjacency, alpha, k, omega) in params["layers"]:
        driven = state[None, :] + x @ transition
        dsmax = driven.max()
        dsmin = driven.min()
        driven = (driven - dsmin) / (dsmax - dsmin)
        thetas = driven @ adjacency
        x = alpha * thetas + omega + (k / TWO_PI) * jnp.sin(TWO_PI * thetas)
    return x @ params["mask"]


if __name__ == "__main__":
    input_size = 4
    output_size = 3
    reservoir_sizes = [32, 64]
    batch = 2

    params = build_params(input_size, output_size, reservoir_sizes,
                          input_spread=1, output_spread=1, seed=0)
    packed = pack_params(params)

    x = jax.random.normal(jax.random.PRNGKey(0), (batch, input_size),
                          dtype=jnp.float32)

    out = multilayer_scm_forward(x, packed)
    out = jax.block_until_ready(out)

    ref = reference_forward(x, params)
    # Tolerance slightly looser than 1e-4: the rank-1 rowsum substitution and
    # the normalization epilogue reorder are FP reassociations of the same f32
    # math (bf16 adjacency is bit-exact, so it contributes no error).
    np.testing.assert_allclose(np.asarray(out), np.asarray(ref),
                               rtol=1e-3, atol=1e-3)

    assert out.shape == (batch, output_size)
    print("KERNEL_OK")
</pallas_src>

<mosaic_0001>
module attributes {stable_mosaic.version = 11 : i64} {
  func.func @kernel(%arg0: memref<8x128xf32, #tpu.memory_space<vmem>>, %arg1: memref<128x128xf32, #tpu.memory_space<vmem>>, %arg2: memref<128x128xbf16, #tpu.memory_space<vmem>>, %arg3: memref<8x128xf32, #tpu.memory_space<vmem>>, %arg4: memref<128x128xbf16, #tpu.memory_space<vmem>>, %arg5: memref<8x128xf32, #tpu.memory_space<vmem>>, %arg6: memref<128x128xf32, #tpu.memory_space<vmem>>, %arg7: memref<8x128xf32, #tpu.memory_space<vmem>>) attributes {dimension_semantics = [], scalar_prefetch = 0 : i64, scratch_operands = 0 : i64, tpu.core_type = #tpu.core_type<tc>} {
    %c0 = arith.constant 0 : index
    %c0_0 = arith.constant 0 : index
    %0 = vector.load %arg0[%c0, %c0_0] : memref<8x128xf32, #tpu.memory_space<vmem>>, vector<8x128xf32>
    %c0_1 = arith.constant 0 : index
    %c0_2 = arith.constant 0 : index
    %1 = vector.load %arg3[%c0_1, %c0_2] : memref<8x128xf32, #tpu.memory_space<vmem>>, vector<1x128xf32>
    %c1 = arith.constant 1 : index
    %c0_3 = arith.constant 0 : index
    %2 = vector.load %arg3[%c1, %c0_3] : memref<8x128xf32, #tpu.memory_space<vmem>>, vector<1x128xf32>
    %c2 = arith.constant 2 : index
    %c0_4 = arith.constant 0 : index
    %3 = vector.load %arg3[%c2, %c0_4] : memref<8x128xf32, #tpu.memory_space<vmem>>, vector<1x128xf32>
    %c3 = arith.constant 3 : index
    %c0_5 = arith.constant 0 : index
    %4 = vector.load %arg3[%c3, %c0_5] : memref<8x128xf32, #tpu.memory_space<vmem>>, vector<1x128xf32>
    %c4 = arith.constant 4 : index
    %c0_6 = arith.constant 0 : index
    %5 = vector.load %arg3[%c4, %c0_6] : memref<8x128xf32, #tpu.memory_space<vmem>>, vector<1x128xf32>
    %c0_7 = arith.constant 0 : index
    %c0_8 = arith.constant 0 : index
    %6 = vector.load %arg1[%c0_7, %c0_8] : memref<128x128xf32, #tpu.memory_space<vmem>>, vector<128x128xf32>
    %cst = arith.constant dense<0.000000e+00> : vector<8x128xf32>
    %7 = tpu.matmul %0, %6, %cst {dimension_numbers = #tpu.dot_dimension_numbers<[1], [0], [0], [1], [0, 0, 1, 1], [], []>} : vector<8x128xf32>, vector<128x128xf32>, vector<8x128xf32> -> vector<8x128xf32>
    %8 = vector.broadcast %1 : vector<1x128xf32> to vector<8x128xf32>
    %9 = arith.addf %8, %7 : vector<8x128xf32>
    %c0_9 = arith.constant 0 : index
    %c0_10 = arith.constant 0 : index
    %10 = vector.load %arg2[%c0_9, %c0_10] : memref<128x128xbf16, #tpu.memory_space<vmem>>, vector<128x128xbf16>
    %11 = arith.extf %10 : vector<128x128xbf16> to vector<128x128xf32>
    %cst_11 = arith.constant dense<0.000000e+00> : vector<8x128xf32>
    %12 = tpu.matmul %9, %11, %cst_11 {dimension_numbers = #tpu.dot_dimension_numbers<[1], [0], [0], [1], [0, 0, 1, 1], [], []>} : vector<8x128xf32>, vector<128x128xf32>, vector<8x128xf32> -> vector<8x128xf32>
    %c5 = arith.constant 5 : index
    %c0_12 = arith.constant 0 : index
    %13 = vector.load %arg3[%c5, %c0_12] : memref<8x128xf32, #tpu.memory_space<vmem>>, vector<1x128xf32>
    %c6 = arith.constant 6 : index
    %c0_13 = arith.constant 0 : index
    %14 = vector.load %arg3[%c6, %c0_13] : memref<8x128xf32, #tpu.memory_space<vmem>>, vector<1x128xf32>
    %15 = vector.broadcast %13 : vector<1x128xf32> to vector<8x128xf32>
    %16 = arith.addf %9, %15 : vector<8x128xf32>
    %17 = vector.shape_cast %16 : vector<8x128xf32> to vector<1x8x128xf32>
    %cst_14 = arith.constant dense<0xFF800000> : vector<1xf32>
    %18 = vector.multi_reduction <maximumf>, %17, %cst_14 [1, 2] : vector<1x8x128xf32> to vector<1xf32>
    %19 = vector.shape_cast %18 : vector<1xf32> to vector<1x1x1xf32>
    %20 = vector.extract %19[0, 0, 0] : f32 from vector<1x1x1xf32>
    %21 = vector.broadcast %14 : vector<1x128xf32> to vector<8x128xf32>
    %22 = arith.addf %9, %21 : vector<8x128xf32>
    %23 = vector.shape_cast %22 : vector<8x128xf32> to vector<1x8x128xf32>
    %cst_15 = arith.constant dense<0x7F800000> : vector<1xf32>
    %24 = vector.multi_reduction <minimumf>, %23, %cst_15 [1, 2] : vector<1x8x128xf32> to vector<1xf32>
    %25 = vector.shape_cast %24 : vector<1xf32> to vector<1x1x1xf32>
    %26 = vector.extract %25[0, 0, 0] : f32 from vector<1x1x1xf32>
    %27 = arith.subf %20, %26 : f32
    %cst_16 = arith.constant 1.000000e+00 : f32
    %28 = arith.divf %cst_16, %27 : f32
    %29 = vector.broadcast %28 : f32 to vector<8x128xf32>
    %30 = arith.mulf %29, %12 : vector<8x128xf32>
    %31 = arith.mulf %28, %26 : f32
    %32 = vector.broadcast %31 : f32 to vector<1x128xf32>
    %33 = arith.mulf %32, %5 : vector<1x128xf32>
    %34 = vector.broadcast %33 : vector<1x128xf32> to vector<8x128xf32>
    %35 = arith.subf %30, %34 : vector<8x128xf32>
    %36 = vector.broadcast %2 : vector<1x128xf32> to vector<8x128xf32>
    %37 = arith.mulf %36, %35 : vector<8x128xf32>
    %38 = vector.broadcast %4 : vector<1x128xf32> to vector<8x128xf32>
    %39 = arith.addf %37, %38 : vector<8x128xf32>
    %cst_17 = arith.constant 6.28318548 : f32
    %40 = vector.broadcast %cst_17 : f32 to vector<8x128xf32>
    %41 = arith.mulf %40, %35 : vector<8x128xf32>
    %42 = math.sin %41 : vector<8x128xf32>
    %43 = vector.broadcast %3 : vector<1x128xf32> to vector<8x128xf32>
    %44 = arith.mulf %43, %42 : vector<8x128xf32>
    %45 = arith.addf %39, %44 : vector<8x128xf32>
    %c0_18 = arith.constant 0 : index
    %c0_19 = arith.constant 0 : index
    %46 = vector.load %arg5[%c0_18, %c0_19] : memref<8x128xf32, #tpu.memory_space<vmem>>, vector<1x128xf32>
    %c1_20 = arith.constant 1 : index
    %c0_21 = arith.constant 0 : index
    %47 = vector.load %arg5[%c1_20, %c0_21] : memref<8x128xf32, #tpu.memory_space<vmem>>, vector<1x128xf32>
    %c2_22 = arith.constant 2 : index
    %c0_23 = arith.constant 0 : index
    %48 = vector.load %arg5[%c2_22, %c0_23] : memref<8x128xf32, #tpu.memory_space<vmem>>, vector<1x128xf32>
    %c3_24 = arith.constant 3 : index
    %c0_25 = arith.constant 0 : index
    %49 = vector.load %arg5[%c3_24, %c0_25] : memref<8x128xf32, #tpu.memory_space<vmem>>, vector<1x128xf32>
    %c4_26 = arith.constant 4 : index
    %c0_27 = arith.constant 0 : index
    %50 = vector.load %arg5[%c4_26, %c0_27] : memref<8x128xf32, #tpu.memory_space<vmem>>, vector<1x128xf32>
    %cst_28 = arith.constant dense<0.000000e+00> : vector<8xf32>
    %51 = vector.multi_reduction <add>, %45, %cst_28 [1] : vector<8x128xf32> to vector<8xf32>
    %52 = vector.shape_cast %51 : vector<8xf32> to vector<8x1xf32>
    %cst_29 = arith.constant 1.562500e-02 : f32
    %53 = vector.broadcast %cst_29 : f32 to vector<8x1xf32>
    %54 = arith.mulf %53, %52 : vector<8x1xf32>
    %55 = vector.broadcast %46 : vector<1x128xf32> to vector<8x128xf32>
    %56 = vector.broadcast %54 : vector<8x1xf32> to vector<8x128xf32>
    %57 = arith.addf %55, %56 : vector<8x128xf32>
    %c0_30 = arith.constant 0 : index
    %c0_31 = arith.constant 0 : index
    %58 = vector.load %arg4[%c0_30, %c0_31] : memref<128x128xbf16, #tpu.memory_space<vmem>>, vector<128x128xbf16>
    %59 = arith.extf %58 : vector<128x128xbf16> to vector<128x128xf32>
    %cst_32 = arith.constant dense<0.000000e+00> : vector<8x128xf32>
    %60 = tpu.matmul %57, %59, %cst_32 {dimension_numbers = #tpu.dot_dimension_numbers<[1], [0], [0], [1], [0, 0, 1, 1], [], []>} : vector<8x128xf32>, vector<128x128xf32>, vector<8x128xf32> -> vector<8x128xf32>
    %c5_33 = arith.constant 5 : index
    %c0_34 = arith.constant 0 : index
    %61 = vector.load %arg5[%c5_33, %c0_34] : memref<8x128xf32, #tpu.memory_space<vmem>>, vector<1x128xf32>
    %c6_35 = arith.constant 6 : index
    %c0_36 = arith.constant 0 : index
    %62 = vector.load %arg5[%c6_35, %c0_36] : memref<8x128xf32, #tpu.memory_space<vmem>>, vector<1x128xf32>
    %63 = vector.broadcast %61 : vector<1x128xf32> to vector<8x128xf32>
    %64 = arith.addf %57, %63 : vector<8x128xf32>
    %65 = vector.shape_cast %64 : vector<8x128xf32> to vector<1x8x128xf32>
    %cst_37 = arith.constant dense<0xFF800000> : vector<1xf32>
    %66 = vector.multi_reduction <maximumf>, %65, %cst_37 [1, 2] : vector<1x8x128xf32> to vector<1xf32>
    %67 = vector.shape_cast %66 : vector<1xf32> to vector<1x1x1xf32>
    %68 = vector.extract %67[0, 0, 0] : f32 from vector<1x1x1xf32>
    %69 = vector.broadcast %62 : vector<1x128xf32> to vector<8x128xf32>
    %70 = arith.addf %57, %69 : vector<8x128xf32>
    %71 = vector.shape_cast %70 : vector<8x128xf32> to vector<1x8x128xf32>
    %cst_38 = arith.constant dense<0x7F800000> : vector<1xf32>
    %72 = vector.multi_reduction <minimumf>, %71, %cst_38 [1, 2] : vector<1x8x128xf32> to vector<1xf32>
    %73 = vector.shape_cast %72 : vector<1xf32> to vector<1x1x1xf32>
    %74 = vector.extract %73[0, 0, 0] : f32 from vector<1x1x1xf32>
    %75 = arith.subf %68, %74 : f32
    %cst_39 = arith.constant 1.000000e+00 : f32
    %76 = arith.divf %cst_39, %75 : f32
    %77 = vector.broadcast %76 : f32 to vector<8x128xf32>
    %78 = arith.mulf %77, %60 : vector<8x128xf32>
    %79 = arith.mulf %76, %74 : f32
    %80 = vector.broadcast %79 : f32 to vector<1x128xf32>
    %81 = arith.mulf %80, %50 : vector<1x128xf32>
    %82 = vector.broadcast %81 : vector<1x128xf32> to vector<8x128xf32>
    %83 = arith.subf %78, %82 : vector<8x128xf32>
    %84 = vector.broadcast %47 : vector<1x128xf32> to vector<8x128xf32>
    %85 = arith.mulf %84, %83 : vector<8x128xf32>
    %86 = vector.broadcast %49 : vector<1x128xf32> to vector<8x128xf32>
    %87 = arith.addf %85, %86 : vector<8x128xf32>
    %cst_40 = arith.constant 6.28318548 : f32
    %88 = vector.broadcast %cst_40 : f32 to vector<8x128xf32>
    %89 = arith.mulf %88, %83 : vector<8x128xf32>
    %90 = math.sin %89 : vector<8x128xf32>
    %91 = vector.broadcast %48 : vector<1x128xf32> to vector<8x128xf32>
    %92 = arith.mulf %91, %90 : vector<8x128xf32>
    %93 = arith.addf %87, %92 : vector<8x128xf32>
    %c0_41 = arith.constant 0 : index
    %c0_42 = arith.constant 0 : index
    %94 = vector.load %arg6[%c0_41, %c0_42] : memref<128x128xf32, #tpu.memory_space<vmem>>, vector<128x128xf32>
    %cst_43 = arith.constant dense<0.000000e+00> : vector<8x128xf32>
    %95 = tpu.matmul %93, %94, %cst_43 {dimension_numbers = #tpu.dot_dimension_numbers<[1], [0], [0], [1], [0, 0, 1, 1], [], []>} : vector<8x128xf32>, vector<128x128xf32>, vector<8x128xf32> -> vector<8x128xf32>
    %c0_44 = arith.constant 0 : index
    %c0_45 = arith.constant 0 : index
    %96 = vector.load %arg7[%c0_44, %c0_45] : memref<8x128xf32, #tpu.memory_space<vmem>>, vector<8x128xf32>
    tpu.vector_store %arg7[%c0_44, %c0_45], %95 {strides = array<i32>} : memref<8x128xf32, #tpu.memory_space<vmem>>, vector<8x128xf32>,
    return
  }
}

</mosaic_0001>

<bundles_post_ra>
// kernel: tpu_custom_call.1
= control target key start
LH: loop header
LB: loop body
LE: loop exit
PB: predicated region body
PF: predicated region fallthrough
CT: control target
= control target key end

     0   :  { %12 = vsyncpa [#allocation3], 0  ;;  %s1746_s0 = inlined_call_operand.hbm [shape: f32[8,128], index: 0, kind: input, shape index: {}]   ;;  %s1747_s1 = inlined_call_operand.hbm [shape: f32[128,128], index: 1, kind: input, shape index: {}]   ;;  %s1748_s2 = inlined_call_operand.hbm [shape: bf16[128,128], index: 2, kind: input, shape index: {}]   ;;  %s1749_s3 = inlined_call_operand.vmem [shape: f32[8,128], index: 3, kind: input, shape index: {}]   ;;  %s1750_s4 = inlined_call_operand.hbm [shape: bf16[128,128], index: 4, kind: input, shape index: {}]   ;;  %s1751_s5 = inlined_call_operand.vmem [shape: f32[8,128], index: 5, kind: input, shape index: {}]   ;;  %s1752_s6 = inlined_call_operand.hbm [shape: f32[128,128], index: 6, kind: input, shape index: {}]   ;;  %s1753_s7 = inlined_call_operand.hbm [shape: f32[8,128], index: 7, kind: output, shape index: {}]  }
   0x1   :  { %13 = vsyncpa [#allocation6], 0 }
   0x2   :  { %14 = vsyncpa [#allocation9], 0 }
   0x3   :  { %15 = vsyncpa [#allocation4], 0  ;;  %s1434_s24 = smov [#allocation5]   ;;  %s1294_s28 = scalar_lea.hbm %s1747_s1, 2048 }
   0x4   :  { %s31_s25 = sshll.u32 %s1434_s24, 4  ;;  %p1295_p0 = scmp.ne.s32.totalorder %s1747_s1, %s1294_s28  ;;  %s32_s25 = int_to_ptr.vmem [resolvable:$true] %s31_s25 }
   0x5   :  { %p1298_p1 = scmp.lt.u32.totalorder %s1294_s28, %s1747_s1 }
   0x7   :  { %p1300_p2 = pnand %p1298_p1, %p1295_p0 }
   0x9   :  { %1303 = shalt.err (!%p1300_p2)
}
   0xa   :  { %s1304_s10 = scalar_lea.vmem %s32_s25, 2048  ;;  %p1309_p4 = scmp.lt.s32.totalorder %s32_s25, %s32_s25 }
   0xb   :  { %p1305_p3 = scmp.ne.s32.totalorder %s32_s25, %s1304_s10  ;;  %p1310_p5 = scmp.lt.s32.totalorder %s1304_s10, %s1304_s10 }
   0xd   :  { %p1311_p6 = por %p1310_p5, %p1309_p4 }
   0xf   :  { %p1312_p7 = pnand %p1311_p6, %p1305_p3 }
  0x11   :  { %1315 = shalt.err (!%p1312_p7)
}
  0x12   :  { %s1435_s11 = smov 128   ;;  %s1436_s12 = smov 8  }
  0x13   :  { %37 = dma.hbm_to_vmem [thread:$0]  %s1747_s1, 2048, %s32_s25, [#allocation6], %s1435_s11, %s1435_s11, %s1436_s12  }
  0x14   :  { %s1437_s15 = smov [#allocation8]   ;;  %s1438_s17 = smov [#allocation2]  }
  0x15   :  { %s57_s16 = sshll.u32 %s1437_s15, 4  ;;  %s22_s18 = sshll.u32 %s1438_s17, 4  ;;  %s58_s16 = int_to_ptr.vmem [resolvable:$true] %s57_s16  ;;  %s23_s18 = int_to_ptr.vmem [resolvable:$true] %s22_s18 }
  0x16   :  { %s1316_s21 = scalar_lea.hbm %s1750_s4, 1024 }
  0x17   :  { %p1317_p8 = scmp.ne.s32.totalorder %s1750_s4, %s1316_s21  ;;  %p1320_p9 = scmp.lt.u32.totalorder %s1316_s21, %s1750_s4 }
  0x19   :  { %p1322_p10 = pnand %p1320_p9, %p1317_p8 }
  0x1b   :  { %1325 = shalt.err (!%p1322_p10)
}
  0x1c   :  { %s1326_s1 = scalar_lea.vmem %s58_s16, 1024  ;;  %p1331_p12 = scmp.lt.s32.totalorder %s58_s16, %s58_s16 }
  0x1d   :  { %p1327_p11 = scmp.ne.s32.totalorder %s58_s16, %s1326_s1  ;;  %p1332_p13 = scmp.lt.s32.totalorder %s1326_s1, %s1326_s1 }
  0x1f   :  { %p1333_p0 = por %p1332_p13, %p1331_p12 }
  0x21   :  { %p1334_p1 = pnand %p1333_p0, %p1327_p11 }
  0x23   :  { %1337 = shalt.err (!%p1334_p1)
}
  0x24   :  { %s1439_s25 = smov 64   ;;  %s1440_s27 = smov 4  }
  0x25   :  { %63 = dma.hbm_to_vmem [thread:$0]  %s1750_s4, 1024, %s58_s16, [#allocation9], %s1439_s25, %s1439_s25, %s1440_s27  }
  0x26   :  { %s1338_s9 = scalar_lea.hbm %s1746_s0, 128 }
  0x27   :  { %p1339_p2 = scmp.ne.s32.totalorder %s1746_s0, %s1338_s9  ;;  %p1342_p3 = scmp.lt.u32.totalorder %s1338_s9, %s1746_s0 }
  0x29   :  { %p1344_p4 = pnand %p1342_p3, %p1339_p2 }
  0x2b   :  { %1347 = shalt.err (!%p1344_p4)
}
  0x2c   :  { %s1348_s17 = scalar_lea.vmem %s23_s18, 128  ;;  %p1353_p6 = scmp.lt.s32.totalorder %s23_s18, %s23_s18 }
  0x2d   :  { %p1349_p5 = scmp.ne.s32.totalorder %s23_s18, %s1348_s17  ;;  %p1354_p7 = scmp.lt.s32.totalorder %s1348_s17, %s1348_s17 }
  0x2f   :  { %p1355_p8 = por %p1354_p7, %p1353_p6 }
  0x31   :  { %p1356_p9 = pnand %p1355_p8, %p1349_p5 }
  0x33   :  { %1359 = shalt.err (!%p1356_p9)
}
  0x34   :  { %25 = dma.hbm_to_vmem [thread:$0]  %s1746_s0, 128, %s23_s18, [#allocation3]  }
  0x35   :  { %s1441_s19 = smov [#allocation7]   ;;  %s1442_s21 = smov [#allocation10]  }
  0x36   :  { %s43_s20 = sshll.u32 %s1441_s19, 4  ;;  %s71_s22 = sshll.u32 %s1442_s21, 4  ;;  %s44_s20 = int_to_ptr.vmem [resolvable:$true] %s43_s20  ;;  %s72_s22 = int_to_ptr.vmem [resolvable:$true] %s71_s22 }
  0x37   :  { %s1360_s26 = scalar_lea.hbm %s1748_s2, 1024 }
  0x38   :  { %p1361_p10 = scmp.ne.s32.totalorder %s1748_s2, %s1360_s26  ;;  %p1364_p11 = scmp.lt.u32.totalorder %s1360_s26, %s1748_s2 }
  0x3a   :  { %p1366_p12 = pnand %p1364_p11, %p1361_p10 }
  0x3c   :  { %1369 = shalt.err (!%p1366_p12)
}
  0x3d   :  { %s1370_s0 = scalar_lea.vmem %s44_s20, 1024  ;;  %p1375_p0 = scmp.lt.s32.totalorder %s44_s20, %s44_s20 }
  0x3e   :  { %p1371_p13 = scmp.ne.s32.totalorder %s44_s20, %s1370_s0  ;;  %p1376_p1 = scmp.lt.s32.totalorder %s1370_s0, %s1370_s0 }
  0x40   :  { %p1377_p2 = por %p1376_p1, %p1375_p0 }
  0x42   :  { %p1378_p3 = pnand %p1377_p2, %p1371_p13 }
  0x44   :  { %1381 = shalt.err (!%p1378_p3)
}
  0x45   :  { %49 = dma.hbm_to_vmem [thread:$0]  %s1748_s2, 1024, %s44_s20, [#allocation6], %s1439_s25, %s1439_s25, %s1440_s27  }
  0x46   :  { %s1382_s13 = scalar_lea.hbm %s1752_s6, 2048 }
  0x47   :  { %p1383_p4 = scmp.ne.s32.totalorder %s1752_s6, %s1382_s13  ;;  %p1386_p5 = scmp.lt.u32.totalorder %s1382_s13, %s1752_s6 }
  0x49   :  { %p1388_p6 = pnand %p1386_p5, %p1383_p4 }
  0x4b   :  { %1391 = shalt.err (!%p1388_p6)
}
  0x4c   :  { %s1392_s16 = scalar_lea.vmem %s72_s22, 2048  ;;  %p1397_p8 = scmp.lt.s32.totalorder %s72_s22, %s72_s22 }
  0x4d   :  { %p1393_p7 = scmp.ne.s32.totalorder %s72_s22, %s1392_s16  ;;  %p1398_p9 = scmp.lt.s32.totalorder %s1392_s16, %s1392_s16 }
  0x4f   :  { %p1399_p10 = por %p1398_p9, %p1397_p8 }
  0x51   :  { %p1400_p11 = pnand %p1399_p10, %p1393_p7 }
  0x53   :  { %1403 = shalt.err (!%p1400_p11)
}
  0x54   :  { %77 = dma.hbm_to_vmem [thread:$0]  %s1752_s6, 2048, %s72_s22, [#allocation9], %s1435_s11, %s1435_s11, %s1436_s12  }
  0x55   :  { %1426 = dma.done.wait [#allocation3], 128  }
  0x56   :  { %1427 = vsyncadd [#allocation3], 4294967168 }
  0x57   :  { %1428 = dma.done.wait [#allocation6], 3072  }
  0x58   :  { %1429 = vsyncadd [#allocation6], 4294964224 }
  0x59   :  { %1430 = dma.done.wait [#allocation9], 3072  }
  0x5a   :  { %1431 = vsyncadd [#allocation9], 4294964224  ;;  %v1443_v0 = vmov 0.0|0.0   ;;  %vm1444_vm0 = vmmov 0   ;;  %v1445_v1 = vmov 0.0   ;;  %v99_v2 = vld [vmem:[#allocation5] sm:$0xff] }
  0x5b   :  { %1147 = vmatprep.subr.bf16.mxu0 %v1443_v0  ;;  %1039 = vmatprep.mubr.msk.f32.mxu0 %vm1444_vm0, %v1445_v1  ;;  %v100_v3 = vld [vmem:[#allocation5 + $0x8] sm:$0xff]  ;;  %v101_v4 = vld [vmem:[#allocation5 + $0x10] sm:$0xff]  ;;  %v102_v6 = vld [vmem:[#allocation5 + $0x18] sm:$0xff] }
  0x5c   :  { %1171 = vmatprep.subr.bf16.mxu1 %v1443_v0  ;;  %1074 = vmatprep.mubr.msk.f32.mxu1 %vm1444_vm0, %v1445_v1  ;;  %v1148_v5 = vpack.c.bf16 %v100_v3, %v99_v2  ;;  %v1151_v7 = vpack.c.bf16 %v102_v6, %v101_v4  ;;  %v103_v8 = vld [vmem:[#allocation5 + $0x20] sm:$0xff]  ;;  %v104_v9 = vld [vmem:[#allocation5 + $0x28] sm:$0xff]  ;;  %v105_v13 = vld [vmem:[#allocation5 + $0x30] sm:$0xff] }
  0x5d   :  { %v862_v10 = vld [vmem:[#allocation7] sm:$0xff]   ;;  %v1154_v11 = vpack.c.bf16 %v104_v9, %v103_v8  ;;  %v925_v12 = vld [vmem:[#allocation7 + $0x8] sm:$0xff]   ;;  %v106_v14 = vld [vmem:[#allocation5 + $0x38] sm:$0xff] }
  0x5e   :  { %1149 = vmatpush3.bf16.msra.mxu0 %v1148_v5  ;;  %1173 = vmatpush3.bf16.msra.mxu1 %v862_v10  ;;  %v1157_v15 = vpack.c.bf16 %v106_v14, %v105_v13  ;;  %v926_v16 = vld [vmem:[#allocation7 + $0x10] sm:$0xff]   ;;  %v107_v17 = vld [vmem:[#allocation5 + $0x40] sm:$0xff]  ;;  %v108_v18 = vld [vmem:[#allocation5 + $0x48] sm:$0xff]  ;;  %v331_v5 = vlaneseq }
  0x5f   :  { %1150 = vmatprep.subr.bf16.mxu0 %v1443_v0  ;;  %1174 = vmatprep.subr.bf16.mxu1 %v1443_v0  ;;  %v1160_v19 = vpack.c.bf16 %v108_v18, %v107_v17  ;;  %v927_v20 = vld [vmem:[#allocation7 + $0x18] sm:$0xff]   ;;  %v109_v21 = vld [vmem:[#allocation5 + $0x50] sm:$0xff]  ;;  %v928_v24 = vld [vmem:[#allocation7 + $0x20] sm:$0xff]  }
  0x60   :  { %v110_v22 = vld [vmem:[#allocation5 + $0x58] sm:$0xff]  ;;  %v111_v25 = vld [vmem:[#allocation5 + $0x60] sm:$0xff]  ;;  %v112_v26 = vld [vmem:[#allocation5 + $0x68] sm:$0xff]  ;;  %v1610_v6 = vshrl.u32 %v331_v5, 7 }
  0x61   :  { %v1163_v23 = vpack.c.bf16 %v110_v22, %v109_v21  ;;  %v1166_v27 = vpack.c.bf16 %v112_v26, %v111_v25  ;;  %v929_v28 = vld [vmem:[#allocation7 + $0x28] sm:$0xff]   ;;  %v113_v29 = vld [vmem:[#allocation5 + $0x70] sm:$0xff]  ;;  %v114_v30 = vld [vmem:[#allocation5 + $0x78] sm:$0xff]  ;;  %v1446_v26 = vmov 683565275  }
  0x62   :  { %1152 = vmatpush3.bf16.msra.mxu0 %v1151_v7  ;;  %1176 = vmatpush3.bf16.msra.mxu1 %v925_v12  ;;  %v1169_v31 = vpack.c.bf16 %v114_v30, %v113_v29  ;;  %v930_v32 = vld [vmem:[#allocation7 + $0x30] sm:$0xff]   ;;  %v93_v33 = vld [vmem:[#allocation2] sm:$0xff]  ;;  %v894_v61 = vld [vmem:[#allocation8] sm:$0xff]   ;;  %v333_v8 = vsub.s32 0, %v1610_v6 }
  0x63   :  { %1153 = vmatprep.subr.bf16.mxu0 %v1443_v0  ;;  %1177 = vmatprep.subr.bf16.mxu1 %v1443_v0  ;;  %v931_v34 = vld [vmem:[#allocation7 + $0x38] sm:$0xff]   ;;  %v932_v62 = vld [vmem:[#allocation8 + $0x8] sm:$0xff]   ;;  %v933_v63 = vld [vmem:[#allocation8 + $0x10] sm:$0xff]  }
  0x64   :  { %v841_v35 = vld [vmem:[%s1749_s3] ss:$0 sm:$0xff]  ;;  %v842_v37 = vld [vmem:[%s1749_s3 + $0x5] ss:$0 sm:$0xff]  ;;  %v843_v41 = vld [vmem:[%s1749_s3 + $0x6] ss:$0 sm:$0xff] }
  0x65   :  { %v935_v2 = vld [vmem:[#allocation8 + $0x20] sm:$0xff]   ;;  %v936_v3 = vld [vmem:[#allocation8 + $0x28] sm:$0xff]   ;;  %v937_v4 = vld [vmem:[#allocation8 + $0x30] sm:$0xff]  }
  0x66   :  { %1155 = vmatpush3.bf16.msra.mxu0 %v1154_v11  ;;  %1179 = vmatpush3.bf16.msra.mxu1 %v926_v16  ;;  %v98_v7 = vld [vmem:[%s1749_s3 + $0x4] sm:$0x1] }
  0x67   :  { %1156 = vmatprep.subr.bf16.mxu0 %v1443_v0  ;;  %1180 = vmatprep.subr.bf16.mxu1 %v1443_v0 }
  0x6a   :  { %1158 = vmatpush3.bf16.msra.mxu0 %v1157_v15  ;;  %1182 = vmatpush3.bf16.msra.mxu1 %v927_v20 }
  0x6b   :  { %1159 = vmatprep.subr.bf16.mxu0 %v1443_v0  ;;  %1183 = vmatprep.subr.bf16.mxu1 %v1443_v0 }
  0x6e   :  { %1161 = vmatpush3.bf16.msra.mxu0 %v1160_v19  ;;  %1185 = vmatpush3.bf16.msra.mxu1 %v928_v24 }
  0x6f   :  { %1162 = vmatprep.subr.bf16.mxu0 %v1443_v0  ;;  %1186 = vmatprep.subr.bf16.mxu1 %v1443_v0 }
  0x72   :  { %1164 = vmatpush3.bf16.msra.mxu0 %v1163_v23  ;;  %1188 = vmatpush3.bf16.msra.mxu1 %v929_v28  ;;  %v1447_v28 = vmov 2475754826  }
  0x73   :  { %1165 = vmatprep.subr.bf16.mxu0 %v1443_v0  ;;  %1189 = vmatprep.subr.bf16.mxu1 %v1443_v0 }
  0x76   :  { %1167 = vmatpush3.bf16.msra.mxu0 %v1166_v27  ;;  %1191 = vmatpush3.bf16.msra.mxu1 %v930_v32 }
  0x77   :  { %1168 = vmatprep.subr.bf16.mxu0 %v1443_v0  ;;  %1192 = vmatprep.subr.bf16.mxu1 %v1443_v0 }
  0x7a   :  { %1170 = vmatpush3.bf16.msra.mxu0 %v1169_v31  ;;  %1194 = vmatpush3.bf16.msra.mxu1 %v931_v34  ;;  %v1448_v31 = vmov 2131351028   ;;  %v1449_v34 = vmov 2102212464  }
  0x7b   :  { %1195 = vmatprep.subr.bf16.mxu0 %v1443_v0  ;;  %1219 = vmatprep.subr.bf16.mxu1 %v1443_v0 }
  0x7d   :  { %1040 = vmatmul.mubr.f32.vlgmr.msra.gmra.mrb[0].mxu0 %v93_v33 }
  0x7e   :  { %1109 = vmatprep.mubr.msk.f32.mxu0 %vm1444_vm0, %v1445_v1  ;;  %1197 = vmatpush3.bf16.msra.mxu0 %v894_v61 }
  0x7f   :  { %1198 = vmatprep.subr.bf16.mxu0 %v1443_v0 }
  0x82   :  { %1200 = vmatpush3.bf16.msra.mxu0 %v932_v62 }
  0x83   :  { %1201 = vmatprep.subr.bf16.mxu0 %v1443_v0 }
  0x86   :  { %1203 = vmatpush3.bf16.msra.mxu0 %v933_v63 }
  0x87   :  { %1204 = vmatprep.subr.bf16.mxu0 %v1443_v0 }
 0x150   :  { %v181_v36 = vpop.f32.mrb[0].mxu0 }
 0x151   :  { %v189_v38 = vadd.f32 %v841_v35, %v181_v36  ;;  %v1041_v39 = vpop.f32.mrb[1].mxu0 }
 0x153   :  { %1075 = vmatmul.mubr.f32.vlgmr.msra.gmra.mrb[0].mxu1 %v189_v38  ;;  %v298_v40 = vadd.f32 %v842_v37, %v189_v38  ;;  %v312_v42 = vadd.f32 %v843_v41, %v189_v38  ;;  %v1450_v37 = vmov 920167782  }
 0x154   :  { %1144 = vmatprep.mubr.msk.f32.mxu1 %vm1444_vm0, %v1445_v1  ;;  %v934_v1 = vld [vmem:[#allocation8 + $0x18] sm:$0xff]  }
 0x155   :  { %299 = vmax.xlane.f32.xlu0 %v298_v40  ;;  %1206 = vmatpush3.bf16.msra.mxu0 %v934_v1  ;;  %v1451_v40 = vmov 1326507024  }
 0x156   :  { %1207 = vmatprep.subr.bf16.mxu0 %v1443_v0 }
 0x159   :  { %313 = vmin.xlane.f32.xlu0 %v312_v42  ;;  %1209 = vmatpush3.bf16.msra.mxu0 %v935_v2 }
 0x15a   :  { %1210 = vmatprep.subr.bf16.mxu0 %v1443_v0 }
 0x15d   :  { %1212 = vmatpush3.bf16.msra.mxu0 %v936_v3 }
 0x15e   :  { %1213 = vmatprep.subr.bf16.mxu0 %v1443_v0 }
 0x161   :  { %1215 = vmatpush3.bf16.msra.mxu0 %v937_v4 }
 0x162   :  { %1216 = vmatprep.subr.bf16.mxu0 %v1443_v0 }
 0x1e2   :  { %v300_v43 = vpop.xlane.xlu0 %299 }
 0x1e3   :  { %v301_v44 = vrot.slane %v300_v43, 4 }
 0x1e5   :  { %v302_v45 = vmax.f32 %v300_v43, %v301_v44 }
 0x1e6   :  { %v314_v46 = vpop.xlane.xlu0 %313 }
 0x1e7   :  { %v303_v47 = vrot.slane %v302_v45, 2  ;;  %v315_v48 = vrot.slane %v314_v46, 4 }
 0x1e9   :  { %v316_v49 = vmin.f32 %v314_v46, %v315_v48  ;;  %v304_v50 = vmax.f32 %v302_v45, %v303_v47 }
 0x1eb   :  { %v317_v51 = vrot.slane %v316_v49, 2  ;;  %v305_v52 = vrot.slane %v304_v50, 1 }
 0x1ed   :  { %v306_v53 = vmax.f32 %v304_v50, %v305_v52  ;;  %v318_v54 = vmin.f32 %v316_v49, %v317_v51 }
 0x1ef   :  { %1243 = vpush %v306_v53  ;;  %v319_v55 = vrot.slane %v318_v54, 1 }
 0x1f1   :  { %v320_v56 = vmin.f32 %v318_v54, %v319_v55 }
 0x1f3   :  { %1245 = vpush %v320_v56 }
 0x220   :  { %s1244_s21 = spop %1243 }
 0x224   :  { %s1600_s22 = spop %1245 }
 0x225   :  { %s322_s23 = ssub.f32 %s1244_s21, %s1600_s22 }
 0x226   :  { %v288_v57 = vpop.f32.mrb[0].mxu1 }
 0x227   :  { %v323_v58 = vstv %s322_s23  ;;  %v1076_v59 = vpop.f32.mrb[1].mxu1 }
 0x228   :  { %1282 = vrcp.f32 %v323_v58 }
 0x232   :  { %v1283_v60 = vpop.eup %1282 }
 0x233   :  { %1247 = vpush %v1283_v60 }
 0x264   :  { %s1248_s24 = spop %1247 }
 0x265   :  { %s328_s28 = smul.f32 %s1248_s24, %s1600_s22  ;;  %v326_v9 = vstv %s1248_s24  ;;  %s1452_s24 = smov [#allocation11]  }
 0x266   :  { %v327_v12 = vmul.f32 %v326_v9, %v288_v57  ;;  %s830_s26 = sshll.u32 %s1452_s24, 4  ;;  %s831_s26 = int_to_ptr.vmem [resolvable:$true] %s830_s26 }
 0x267   :  { %v329_v10 = vstv %s328_s28  ;;  %s1404_s1 = scalar_lea.vmem %s831_s26, 128  ;;  %p1409_p13 = scmp.lt.s32.totalorder %s831_s26, %s831_s26 }
 0x268   :  { %v330_v11 = vmul.f32 %v329_v10, %v98_v7  ;;  %p1405_p12 = scmp.ne.s32.totalorder %s831_s26, %s1404_s1  ;;  %p1410_p0 = scmp.lt.s32.totalorder %s1404_s1, %s1404_s1 }
 0x26a   :  { %v334_v13 = vrot.slane %v330_v11, %v333_v8  ;;  %p1411_p1 = por %p1410_p0, %p1409_p13 }
 0x26c   :  { %v1619_v14 = vsub.f32 %v327_v12, %v334_v13  ;;  %p1412_p2 = pnand %p1411_p1, %p1405_p12 }
 0x26e   :  { %v1622_v15 = vmul.f32 6.2831855, %v1619_v14 }
 0x270   :  { %v350_v16 = vand.u32 2139095040, %v1622_v15  ;;  %v347_v20 = vand.u32 2147483647, %v1622_v15  ;;  %vm349_vm8 = vcmp.lt.s32.totalorder %v1622_v15, 0  ;;  %vm439_vm13 = vweird.f32 %v1622_v15 }
 0x272   :  { %v351_v17 = vshrl.u32 %v350_v16, 23  ;;  %v354_v24 = vand.u32 8388607, %v347_v20  ;;  %vm348_vm9 = vcmp.le.f32.partialorder %v347_v20, 0.7853982 }
 0x274   :  { %v846_v18 = vadd.s32 4294967169, %v351_v17  ;;  %v355_v42 = vor.u32 8388608, %v354_v24 }
 0x276   :  { %v357_v19 = vadd.s32 1, %v846_v18  ;;  %v395_v56 = vshll.u32 %v355_v42, 8 }
 0x278   :  { %vm358_vm1 = vcmp.gt.s32.totalorder %v357_v19, 0 }
 0x279   :  { %v359_v21 = vsel %vm358_vm1, %v357_v19, 0 }
 0x27a   :  { %v361_v22 = vand.u32 31, %v359_v21  ;;  %v360_v25 = vshrl.u32 %v359_v21, 5 }
 0x27c   :  { %v362_v23 = vsub.s32 32, %v361_v22  ;;  %v364_v27 = vshll.u32 %v1446_v26, %v361_v22  ;;  %v367_v29 = vshll.u32 %v1447_v28, %v361_v22  ;;  %v370_v33 = vshll.u32 %v1448_v31, %v361_v22 }
 0x27d   :  { %v373_v36 = vshll.u32 %v1449_v34, %v361_v22  ;;  %v376_v39 = vshll.u32 %v1450_v37, %v361_v22  ;;  %vm379_vm2 = vcmp.lt.s32.totalorder %v360_v25, 1  ;;  %vm382_vm3 = vcmp.lt.s32.totalorder %v360_v25, 4 }
 0x27e   :  { %v365_v30 = vshrl.u32 %v1447_v28, %v362_v23  ;;  %v368_v32 = vshrl.u32 %v1448_v31, %v362_v23  ;;  %v371_v35 = vshrl.u32 %v1449_v34, %v362_v23  ;;  %v374_v38 = vshrl.u32 %v1450_v37, %v362_v23 }
 0x27f   :  { %v377_v41 = vshrl.u32 %v1451_v40, %v362_v23  ;;  %v363_v51 = vshrl.u32 %v1446_v26, %v362_v23  ;;  %vm381_vm4 = vcmp.lt.s32.totalorder %v360_v25, 3  ;;  %vm380_vm5 = vcmp.lt.s32.totalorder %v360_v25, 2 }
 0x280   :  { %v366_v43 = vor.u32 %v365_v30, %v364_v27  ;;  %v369_v44 = vor.u32 %v368_v32, %v367_v29  ;;  %v372_v45 = vor.u32 %v371_v35, %v370_v33  ;;  %v375_v46 = vor.u32 %v374_v38, %v373_v36 }
 0x281   :  { %v378_v47 = vor.u32 %v377_v41, %v376_v39 }
 0x282   :  { %v384_v48 = vsel %vm382_vm3, %v372_v45, 2102212464  ;;  %v387_v49 = vsel %vm379_vm2, %v366_v43, %v369_v44  ;;  %v391_v50 = vsel %vm379_vm2, %v369_v44, %v372_v45  ;;  %v388_v52 = vsel %vm382_vm3, %v375_v46, 920167782 }
 0x283   :  { %v392_v53 = vsel %vm382_vm3, %v378_v47, 1326507024  ;;  %v389_v54 = vsel %vm381_vm4, %v372_v45, %v388_v52  ;;  %v383_v57 = vsel %vm379_vm2, %v363_v51, %v366_v43  ;;  %v385_v58 = vsel %vm381_vm4, %v369_v44, %v384_v48  ;;  %v844_v48 = vld [vmem:[%s1749_s3 + $0x1] ss:$0 sm:$0xff] }
 0x284   :  { %v393_v55 = vsel %vm381_vm4, %v375_v46, %v392_v53  ;;  %v390_v59 = vsel %vm380_vm5, %v387_v49, %v389_v54  ;;  %v386_v2 = vsel %vm380_vm5, %v383_v57, %v385_v58  ;;  %v340_v20 = vmul.f32 %v844_v48, %v1619_v14  ;;  %v850_v53 = vld [vmem:[%s1749_s3 + $0x2] ss:$0 sm:$0xff]  ;;  %v845_v54 = vld [vmem:[%s1749_s3 + $0x3] ss:$0 sm:$0xff] }
 0x285   :  { %v394_v60 = vsel %vm380_vm5, %v391_v50, %v393_v55  ;;  %v1642_v63 = vmul.u32.u64.low %v395_v56, %v390_v59  ;;  %v1643_v1 = vmul.u32.u64.high %v395_v56, %v390_v59, %v1642_v63  ;;  %v402_v4 = vmul.u32 %v395_v56, %v386_v2  ;;  %v938_v14 = vld [vmem:[#allocation8 + $0x38] sm:$0xff]  }
 0x286   :  { %v1639_v61 = vmul.u32.u64.low %v395_v56, %v394_v60  ;;  %v1640_v62 = vmul.u32.u64.high %v395_v56, %v394_v60, %v1639_v61  ;;  %v345_v58 = vadd.f32 %v845_v54, %v340_v20  ;;  %1218 = vmatpush3.bf16.msra.mxu0 %v938_v14  ;;  %v749_v20 = vld [vmem:[#allocation10 + $0x60] sm:$0xff]  ;;  %v751_v54 = vld [vmem:[#allocation10 + $0x70] sm:$0xff] }
 0x287   :  { %v405_v3 = vadd.s32 1, %v1643_v1  ;;  %v851_v61 = vld [vmem:[%s1751_s5] ss:$0 sm:$0xff] }
 0x288   :  { %vm404_vm6 = vc.u32 %v1640_v62, %v1642_v63  ;;  %v403_v21 = vadd.s32 %v1642_v63, %v1640_v62 }
 0x289   :  { %v406_v5 = vsel %vm404_vm6, %v405_v3, %v1643_v1  ;;  %v853_v1 = vld [vmem:[%s1751_s5 + $0x6] ss:$0 sm:$0xff] }
 0x28a   :  { %v407_v7 = vadd.s32 %v406_v5, %v402_v4 }
 0x28c   :  { %v408_v9 = vadd.s32 536870912, %v407_v7 }
 0x28e   :  { %v409_v10 = vshrl.u32 %v408_v9, 30 }
 0x290   :  { %v410_v11 = vshll.u32 %v409_v10, 30  ;;  %v433_v38 = vsub.s32 4, %v409_v10 }
 0x292   :  { %v411_v12 = vsub.s32 %v407_v7, %v410_v11  ;;  %v434_v42 = vsel %vm349_vm8, %v433_v38, %v409_v10  ;;  %v741_v38 = vld [vmem:[#allocation10 + $0x20] sm:$0xff] }
 0x293   :  { %v436_v44 = vsel %vm348_vm9, 0, %v434_v42  ;;  %v743_v42 = vld [vmem:[#allocation10 + $0x30] sm:$0xff] }
 0x294   :  { %v413_v13 = vsub.s32 0, %v411_v12  ;;  %v440_v45 = vadd.s32 3, %v436_v44 }
 0x296   :  { %v847_v16 = vmin.u32 %v413_v13, %v411_v12  ;;  %v441_v46 = vand.u32 3, %v440_v45 }
 0x298   :  { %v415_v17 = vclz %v847_v16  ;;  %vm446_vm10 = vcmp.eq.s32.totalorder %v441_v46, 2  ;;  %vm443_vm11 = vcmp.eq.s32.totalorder %v441_v46, 0  ;;  %vm442_vm12 = vcmp.lt.s32.totalorder %v441_v46, 2  ;;  %v745_v46 = vld [vmem:[#allocation10 + $0x40] sm:$0xff] }
 0x29a   :  { %v848_v18 = vadd.s32 4294967294, %v415_v17 }
 0x29c   :  { %vm849_vm7 = vcmp.lt.s32.totalorder %v848_v18, 0 }
 0x29d   :  { %v418_v19 = vsel %vm849_vm7, 0, %v848_v18 }
 0x29e   :  { %v419_v22 = vsub.s32 32, %v418_v19  ;;  %v423_v23 = vsub.s32 4294967266, %v418_v19  ;;  %v420_v24 = vshll.u32 %v411_v12, %v418_v19 }
 0x2a0   :  { %v421_v25 = vshrl.u32 %v403_v21, %v419_v22  ;;  %v424_v27 = vadd.s32 127, %v423_v23 }
 0x2a2   :  { %v422_v29 = vor.u32 %v421_v25, %v420_v24  ;;  %v425_v30 = vshll.u32 %v424_v27, 23  ;;  %v737_v24 = vld [vmem:[#allocation10] sm:$0xff]  ;;  %v738_v25 = vld [vmem:[#allocation10 + $0x8] sm:$0xff] }
 0x2a3   :  { %v1220_v27 = vpack.c.bf16 %v738_v25, %v737_v24 }
 0x2a4   :  { %v426_v32 = vor.u32 4788187, %v425_v30  ;;  %v429_v35 = vcvt.s32.f32 %v422_v29 }
 0x2a5   :  { %1221 = vmatpush3.bf16.msra.mxu1 %v1220_v27 }
 0x2a6   :  { %v427_v33 = vand.u32 2147483647, %v426_v32  ;;  %1222 = vmatprep.subr.bf16.mxu1 %v1443_v0  ;;  %v739_v32 = vld [vmem:[#allocation10 + $0x10] sm:$0xff] }
 0x2a8   :  { %v430_v36 = vmul.f32 %v429_v35, %v427_v33  ;;  %v740_v33 = vld [vmem:[#allocation10 + $0x18] sm:$0xff] }
 0x2aa   :  { %v431_v39 = vxor.u32 2147483648, %v430_v36 }
 0x2ac   :  { %v432_v41 = vsel %vm349_vm8, %v431_v39, %v430_v36  ;;  %v1223_v36 = vpack.c.bf16 %v740_v33, %v739_v32  ;;  %v742_v39 = vld [vmem:[#allocation10 + $0x28] sm:$0xff] }
 0x2ad   :  { %v435_v43 = vsel %vm348_vm9, %v1622_v15, %v432_v41  ;;  %v852_v15 = vld [vmem:[%s1751_s5 + $0x5] ss:$0 sm:$0xff]  ;;  %v1226_v41 = vpack.c.bf16 %v742_v39, %v741_v38 }
 0x2ae   :  { %1284 = vcosq.f32 %v435_v43  ;;  %1224 = vmatpush3.bf16.msra.mxu1 %v1223_v36 }
 0x2af   :  { %1286 = vsinq.f32 %v435_v43  ;;  %1225 = vmatprep.subr.bf16.mxu1 %v1443_v0  ;;  %v744_v43 = vld [vmem:[#allocation10 + $0x38] sm:$0xff] }
 0x2b0   :  { %v1229_v45 = vpack.c.bf16 %v744_v43, %v743_v42 }
 0x2b2   :  { %1227 = vmatpush3.bf16.msra.mxu1 %v1226_v41 }
 0x2b3   :  { %1228 = vmatprep.subr.bf16.mxu1 %v1443_v0 }
 0x2b6   :  { %1230 = vmatpush3.bf16.msra.mxu1 %v1229_v45 }
 0x2b7   :  { %1231 = vmatprep.subr.bf16.mxu1 %v1443_v0 }
 0x2b8   :  { %v1285_v47 = vpop.eup %1284 }
 0x2b9   :  { %v1287_v49 = vpop.eup %1286  ;;  %v447_v50 = vxor.u32 2147483648, %v1285_v47 }
 0x2ba   :  { %v444_v51 = vxor.u32 2147483648, %v1287_v49 }
 0x2bb   :  { %v448_v52 = vsel %vm446_vm10, %v447_v50, %v1287_v49  ;;  %v747_v49 = vld [vmem:[#allocation10 + $0x50] sm:$0xff]  ;;  %v748_v50 = vld [vmem:[#allocation10 + $0x58] sm:$0xff] }
 0x2bc   :  { %v445_v55 = vsel %vm443_vm11, %v1285_v47, %v444_v51  ;;  %v746_v47 = vld [vmem:[#allocation10 + $0x48] sm:$0xff]  ;;  %v1235_v51 = vpack.c.bf16 %v748_v50, %v747_v49 }
 0x2bd   :  { %v449_v56 = vsel %vm442_vm12, %v445_v55, %v448_v52  ;;  %v1232_v48 = vpack.c.bf16 %v746_v47, %v745_v46  ;;  %v750_v52 = vld [vmem:[#allocation10 + $0x68] sm:$0xff]  ;;  %v752_v55 = vld [vmem:[#allocation10 + $0x78] sm:$0xff] }
 0x2be   :  { %v450_v57 = vsel %vm439_vm13, nan, %v449_v56  ;;  %v1241_v56 = vpack.c.bf16 %v752_v55, %v751_v54 }
 0x2bf   :  { %v455_v59 = vmul.f32 %v850_v53, %v450_v57  ;;  %1233 = vmatpush3.bf16.msra.mxu1 %v1232_v48  ;;  %v1238_v53 = vpack.c.bf16 %v750_v52, %v749_v20  ;;  %v461_v57 = vld [vmem:[%s1751_s5 + $0x4] sm:$0x1] }
 0x2c0   :  { %1234 = vmatprep.subr.bf16.mxu1 %v1443_v0 }
 0x2c1   :  { %v456_v60 = vadd.f32 %v455_v59, %v345_v58 }
 0x2c3   :  { %462 = vadd.xlane.f32.xlu1 %v456_v60  ;;  %1236 = vmatpush3.bf16.msra.mxu1 %v1235_v51 }
 0x2c4   :  { %1237 = vmatprep.subr.bf16.mxu1 %v1443_v0 }
 0x2c7   :  { %1239 = vmatpush3.bf16.msra.mxu1 %v1238_v53 }
 0x2c8   :  { %1240 = vmatprep.subr.bf16.mxu1 %v1443_v0 }
 0x2cb   :  { %1242 = vmatpush3.bf16.msra.mxu1 %v1241_v56 }
 0x350   :  { %v463_v62 = vpop.xlane.xlu1 %462 }
 0x351   :  { %v464_v63 = vmul.f32 0.015625, %v463_v62 }
 0x353   :  { %v469_v2 = vadd.f32 %v851_v61, %v464_v63 }
 0x355   :  { %1110 = vmatmul.mubr.f32.vlgmr.msra.gmra.mrb[2].mxu0 %v469_v2  ;;  %v592_v3 = vadd.f32 %v853_v1, %v469_v2  ;;  %v578_v4 = vadd.f32 %v852_v15, %v469_v2 }
 0x357   :  { %593 = vmin.xlane.f32.xlu0 %v592_v3  ;;  %579 = vmax.xlane.f32.xlu1 %v578_v4 }
 0x3e4   :  { %v594_v5 = vpop.xlane.xlu0 %593  ;;  %v580_v7 = vpop.xlane.xlu1 %579 }
 0x3e5   :  { %v595_v9 = vrot.slane %v594_v5, 4  ;;  %v581_v10 = vrot.slane %v580_v7, 4 }
 0x3e7   :  { %v596_v11 = vmin.f32 %v594_v5, %v595_v9  ;;  %v582_v12 = vmax.f32 %v580_v7, %v581_v10 }
 0x3e9   :  { %v597_v13 = vrot.slane %v596_v11, 2  ;;  %v583_v16 = vrot.slane %v582_v12, 2 }
 0x3eb   :  { %v598_v17 = vmin.f32 %v596_v11, %v597_v13  ;;  %v584_v18 = vmax.f32 %v582_v12, %v583_v16 }
 0x3ed   :  { %v585_v19 = vrot.slane %v584_v18, 1  ;;  %v599_v21 = vrot.slane %v598_v17, 1 }
 0x3ef   :  { %v586_v22 = vmax.f32 %v584_v18, %v585_v19  ;;  %v600_v23 = vmin.f32 %v598_v17, %v599_v21 }
 0x3f1   :  { %1253 = vpush %v586_v22 }
 0x3f2   :  { %1255 = vpush %v600_v23 }
 0x422   :  { %s1254_s4 = spop %1253 }
 0x423   :  { %s1673_s16 = spop %1255 }
 0x424   :  { %s602_s2 = ssub.f32 %s1254_s4, %s1673_s16 }
 0x426   :  { %v603_v29 = vstv %s602_s2 }
 0x427   :  { %1288 = vrcp.f32 %v603_v29 }
 0x428   :  { %v568_v30 = vpop.f32.mrb[2].mxu0 }
 0x429   :  { %v1111_v35 = vpop.f32.mrb[3].mxu0 }
 0x431   :  { %v1289_v44 = vpop.eup %1288 }
 0x432   :  { %1257 = vpush %v1289_v44 }
 0x463   :  { %s1258_s25 = spop %1257 }
 0x464   :  { %s608_s12 = smul.f32 %s1258_s25, %s1673_s16  ;;  %v606_v58 = vstv %s1258_s25 }
 0x465   :  { %v607_v14 = vmul.f32 %v606_v58, %v568_v30 }
 0x466   :  { %v609_v59 = vstv %s608_s12 }
 0x467   :  { %v610_v60 = vmul.f32 %v609_v59, %v461_v57 }
 0x469   :  { %v614_v61 = vrot.slane %v610_v60, %v333_v8 }
 0x46b   :  { %v1689_v62 = vsub.f32 %v607_v14, %v614_v61 }
 0x46d   :  { %v1692_v63 = vmul.f32 6.2831855, %v1689_v62 }
 0x46f   :  { %v630_v0 = vand.u32 2139095040, %v1692_v63  ;;  %v627_v3 = vand.u32 2147483647, %v1692_v63  ;;  %vm629_vm5 = vcmp.lt.s32.totalorder %v1692_v63, 0  ;;  %vm719_vm10 = vweird.f32 %v1692_v63 }
 0x471   :  { %v631_v1 = vshrl.u32 %v630_v0, 23  ;;  %v634_v7 = vand.u32 8388607, %v627_v3  ;;  %vm628_vm6 = vcmp.le.f32.partialorder %v627_v3, 0.7853982 }
 0x473   :  { %v856_v15 = vadd.s32 4294967169, %v631_v1  ;;  %v635_v22 = vor.u32 8388608, %v634_v7 }
 0x475   :  { %v637_v2 = vadd.s32 1, %v856_v15 }
 0x477   :  { %vm638_vm14 = vcmp.gt.s32.totalorder %v637_v2, 0 }
 0x478   :  { %v639_v4 = vsel %vm638_vm14, %v637_v2, 0 }
 0x479   :  { %v641_v5 = vand.u32 31, %v639_v4  ;;  %v640_v8 = vshrl.u32 %v639_v4, 5 }
 0x47b   :  { %v642_v6 = vsub.s32 32, %v641_v5  ;;  %v644_v9 = vshll.u32 %v1446_v26, %v641_v5  ;;  %v647_v10 = vshll.u32 %v1447_v28, %v641_v5  ;;  %v650_v13 = vshll.u32 %v1448_v31, %v641_v5 }
 0x47c   :  { %v653_v17 = vshll.u32 %v1449_v34, %v641_v5  ;;  %v656_v19 = vshll.u32 %v1450_v37, %v641_v5  ;;  %vm659_vm15 = vcmp.lt.s32.totalorder %v640_v8, 1  ;;  %vm662_vm0 = vcmp.lt.s32.totalorder %v640_v8, 4 }
 0x47d   :  { %v645_v11 = vshrl.u32 %v1447_v28, %v642_v6  ;;  %v648_v12 = vshrl.u32 %v1448_v31, %v642_v6  ;;  %v651_v16 = vshrl.u32 %v1449_v34, %v642_v6  ;;  %v654_v18 = vshrl.u32 %v1450_v37, %v642_v6 }
 0x47e   :  { %v657_v21 = vshrl.u32 %v1451_v40, %v642_v6  ;;  %v643_v32 = vshrl.u32 %v1446_v26, %v642_v6  ;;  %vm661_vm1 = vcmp.lt.s32.totalorder %v640_v8, 3  ;;  %vm660_vm2 = vcmp.lt.s32.totalorder %v640_v8, 2 }
 0x47f   :  { %v646_v23 = vor.u32 %v645_v11, %v644_v9  ;;  %v649_v24 = vor.u32 %v648_v12, %v647_v10  ;;  %v652_v25 = vor.u32 %v651_v16, %v650_v13  ;;  %v655_v27 = vor.u32 %v654_v18, %v653_v17  ;;  %v854_v18 = vld [vmem:[%s1751_s5 + $0x1] ss:$0 sm:$0xff] }
 0x480   :  { %v658_v28 = vor.u32 %v657_v21, %v656_v19  ;;  %v675_v40 = vshll.u32 %v635_v22, 8  ;;  %v620_v3 = vmul.f32 %v854_v18, %v1689_v62 }
 0x481   :  { %v664_v29 = vsel %vm662_vm0, %v652_v25, 2102212464  ;;  %v667_v31 = vsel %vm659_vm15, %v646_v23, %v649_v24  ;;  %v671_v30 = vsel %vm659_vm15, %v649_v24, %v652_v25  ;;  %v668_v34 = vsel %vm662_vm0, %v655_v27, 920167782 }
 0x482   :  { %v672_v33 = vsel %vm662_vm0, %v658_v28, 1326507024  ;;  %v669_v37 = vsel %vm661_vm1, %v652_v25, %v668_v34  ;;  %v663_v36 = vsel %vm659_vm15, %v643_v32, %v646_v23  ;;  %v665_v38 = vsel %vm661_vm1, %v649_v24, %v664_v29  ;;  %v855_v24 = vld [vmem:[%s1751_s5 + $0x3] ss:$0 sm:$0xff]  ;;  %v860_v25 = vld [vmem:[%s1751_s5 + $0x2] ss:$0 sm:$0xff] }
 0x483   :  { %v673_v35 = vsel %vm661_vm1, %v655_v27, %v672_v33  ;;  %v670_v39 = vsel %vm660_vm2, %v667_v31, %v669_v37  ;;  %v666_v46 = vsel %vm660_vm2, %v663_v36, %v665_v38  ;;  %v625_v31 = vadd.f32 %v855_v24, %v620_v3 }
 0x484   :  { %v674_v41 = vsel %vm660_vm2, %v671_v30, %v673_v35  ;;  %v1712_v44 = vmul.u32.u64.low %v675_v40, %v670_v39  ;;  %v1713_v45 = vmul.u32.u64.high %v675_v40, %v670_v39, %v1712_v44  ;;  %v682_v47 = vmul.u32 %v675_v40, %v666_v46 }
 0x485   :  { %v1709_v42 = vmul.u32.u64.low %v675_v40, %v674_v41  ;;  %v1710_v43 = vmul.u32.u64.high %v675_v40, %v674_v41, %v1709_v42 }
 0x486   :  { %v685_v26 = vadd.s32 1, %v1713_v45 }
 0x487   :  { %vm684_vm3 = vc.u32 %v1710_v43, %v1712_v44  ;;  %v683_v58 = vadd.s32 %v1712_v44, %v1710_v43 }
 0x488   :  { %v686_v48 = vsel %vm684_vm3, %v685_v26, %v1713_v45 }
 0x489   :  { %v687_v49 = vadd.s32 %v686_v48, %v682_v47 }
 0x48b   :  { %v688_v50 = vadd.s32 536870912, %v687_v49 }
 0x48d   :  { %v689_v51 = vshrl.u32 %v688_v50, 30 }
 0x48f   :  { %v690_v20 = vshll.u32 %v689_v51, 30  ;;  %v713_v6 = vsub.s32 4, %v689_v51 }
 0x491   :  { %v691_v52 = vsub.s32 %v687_v49, %v690_v20  ;;  %v714_v10 = vsel %vm629_vm5, %v713_v6, %v689_v51 }
 0x492   :  { %v716_v12 = vsel %vm628_vm6, 0, %v714_v10 }
 0x493   :  { %v693_v53 = vsub.s32 0, %v691_v52  ;;  %v720_v13 = vadd.s32 3, %v716_v12 }
 0x495   :  { %v857_v54 = vmin.u32 %v693_v53, %v691_v52  ;;  %v721_v16 = vand.u32 3, %v720_v13 }
 0x497   :  { %v695_v55 = vclz %v857_v54  ;;  %vm726_vm7 = vcmp.eq.s32.totalorder %v721_v16, 2  ;;  %vm723_vm8 = vcmp.eq.s32.totalorder %v721_v16, 0  ;;  %vm722_vm9 = vcmp.lt.s32.totalorder %v721_v16, 2 }
 0x499   :  { %v858_v56 = vadd.s32 4294967294, %v695_v55 }
 0x49b   :  { %vm859_vm4 = vcmp.lt.s32.totalorder %v858_v56, 0 }
 0x49c   :  { %v698_v57 = vsel %vm859_vm4, 0, %v858_v56 }
 0x49d   :  { %v699_v59 = vsub.s32 32, %v698_v57  ;;  %v703_v60 = vsub.s32 4294967266, %v698_v57  ;;  %v700_v14 = vshll.u32 %v691_v52, %v698_v57 }
 0x49f   :  { %v701_v61 = vshrl.u32 %v683_v58, %v699_v59  ;;  %v704_v0 = vadd.s32 127, %v703_v60 }
 0x4a1   :  { %v702_v1 = vor.u32 %v701_v61, %v700_v14  ;;  %v705_v15 = vshll.u32 %v704_v0, 23 }
 0x4a3   :  { %v706_v2 = vor.u32 4788187, %v705_v15  ;;  %v709_v5 = vcvt.s32.f32 %v702_v1 }
 0x4a5   :  { %v707_v4 = vand.u32 2147483647, %v706_v2 }
 0x4a7   :  { %v710_v7 = vmul.f32 %v709_v5, %v707_v4 }
 0x4a9   :  { %v711_v8 = vxor.u32 2147483648, %v710_v7 }
 0x4ab   :  { %v712_v9 = vsel %vm629_vm5, %v711_v8, %v710_v7 }
 0x4ac   :  { %v715_v11 = vsel %vm628_vm6, %v1692_v63, %v712_v9 }
 0x4ad   :  { %1290 = vcosq.f32 %v715_v11 }
 0x4ae   :  { %1292 = vsinq.f32 %v715_v11 }
 0x4b7   :  { %v1291_v17 = vpop.eup %1290 }
 0x4b8   :  { %v1293_v19 = vpop.eup %1292  ;;  %v727_v21 = vxor.u32 2147483648, %v1291_v17 }
 0x4b9   :  { %v724_v22 = vxor.u32 2147483648, %v1293_v19 }
 0x4ba   :  { %v728_v23 = vsel %vm726_vm7, %v727_v21, %v1293_v19 }
 0x4bb   :  { %v725_v27 = vsel %vm723_vm8, %v1291_v17, %v724_v22 }
 0x4bc   :  { %v729_v28 = vsel %vm722_vm9, %v725_v27, %v728_v23 }
 0x4bd   :  { %v730_v29 = vsel %vm719_vm10, nan, %v729_v28 }
 0x4be   :  { %v735_v30 = vmul.f32 %v860_v25, %v730_v29 }
 0x4c0   :  { %v736_v32 = vadd.f32 %v735_v30, %v625_v31 }
 0x4c2   :  { %1145 = vmatmul.mubr.f32.vlgmr.msra.gmra.mrb[2].mxu1 %v736_v32 }
 0x595   :  { %v819_v62 = vpop.f32.mrb[2].mxu1 }
 0x596   :  { %823 = vst [vmem:[#allocation11] sm:$0xff] %v819_v62  ;;  %v1146_v34 = vpop.f32.mrb[3].mxu1 }
 0x597   :  { %1415 = shalt.err (!%p1412_p2)
}
 0x598   :  { %s1416_s29 = scalar_lea.hbm %s1753_s7, 128 }
 0x599   :  { %p1417_p3 = scmp.ne.s32.totalorder %s1753_s7, %s1416_s29  ;;  %p1420_p4 = scmp.lt.u32.totalorder %s1416_s29, %s1753_s7 }
 0x59b   :  { %p1422_p5 = pnand %p1420_p4, %p1417_p3 }
 0x59d   :  { %1425 = shalt.err (!%p1422_p5)
}
 0x59e   :  { %833 = dma.vmem_to_hbm [thread:$0]  %s831_s26, 128, %s1753_s7, [#allocation4]  }
 0x59f   :  { %1432 = dma.done.wait [#allocation4], 128  }
 0x5a0   :  { %1433 = vsyncadd [#allocation4], 4294967168 }
 0x5a1   :  { %837 = vsyncpa [#allocation3], 1 }
 0x5a2   :  { %838 = vsyncpa [#allocation6], 1 }
 0x5a3   :  { %839 = vsyncpa [#allocation9], 1 }
 0x5a4   :  { %840 = vsyncpa [#allocation4], 1 }

</bundles_post_ra>
